<compile_context>
chip_gen: v6e
topology: v6e:2x2x1
jax: 0.10.0
libtpu: 0.0.40
codegen_flags: <defaults>
</compile_context>

<pallas_src>
import functools

import jax
import jax.numpy as jnp
from jax import lax
from jax.experimental import pallas as pl
from jax.experimental.pallas import tpu as pltpu


def ob_kernel(
    scal_ref,     # SMEM (4,)        [a_s, c_s, Fs1, pad]
    x_ref,        # (B*N, Dp)        population, batch folded into rows, lane-dense
    attnfit_ref,  # (N+B, N)         rows 0..N-1: Fs0*softmax(attn); rows N..: fatherfit
    w1_ref,       # (Dp, Dp)         mut layer-1 weight, PyTorch (out, in) orientation
    w2_ref,       # (Dp, Dp)         mut layer-2 weight
    bias_ref,     # (2, Dp)          [b1; b2]
    coef_ref,     # (B*N, 4)         [f1, f2, f3, fatherfit] per folded row
    out_ref,      # (B*N, Dp)
    cp_ref,       # VMEM scratch (B*N, Dp) crosspop accumulator
    *, matmul_dtype,
):
    NB, N = attnfit_ref.shape
    B = NB - N

    a_s = scal_ref[0]          # D^-0.5 * <qw, kw>
    c_s = scal_ref[1]          # D^-0.5 * <qb, kw>
    fs1 = scal_ref[2]          # softmax(F)[1]

    attn_s = attnfit_ref[0:N, :]                                   # (N, N)

    def batch_body(b, carry):
        row0 = b * N
        if not isinstance(b, int):
            row0 = pl.multiple_of(row0, N)                         # aligned 8-row slabs

        # fitx = softmax(fatherfit) over the population axis (lane-dense row).
        frow = attnfit_ref[pl.ds(N + b, 1), :]                     # (1, N) raw fitness
        mx = jnp.max(frow, axis=-1, keepdims=True)                 # (1, 1)
        er = jnp.exp(frow - mx)                                    # (1, N)
        inv = pl.reciprocal(jnp.sum(er, axis=-1, keepdims=True), approx=True)
        fitx_row = er * inv                                        # (1, N)

        # Same softmax as an (N, 1) column, rebuilt from the folded fitness
        # column already packed in coef_ref (no extra input, no transpose).
        fcol = coef_ref[pl.ds(row0, N), 3:4]                       # (N, 1)
        fitx_col = jnp.exp(fcol - mx) * inv                        # (N, 1)

        # Rank-1 collapse of the q/k Linear(1, H) fitness attention:
        #   logits[n, m] = (a_s*fitx_n + c_s) * fitx_m
        # (terms constant along m cancel inside the row softmax).
        logits = (a_s * fitx_col + c_s) * fitx_row                 # (N, N)
        lmax = jnp.max(logits, axis=-1, keepdims=True)
        p = jnp.exp(logits - lmax)
        fitattn = p * pl.reciprocal(jnp.sum(p, axis=-1, keepdims=True), approx=True)

        w_b = attn_s + fs1 * fitattn                               # combined attention
        xb = x_ref[pl.ds(row0, N), :]                              # (N, Dp)
        cp_ref[pl.ds(row0, N), :] = jnp.dot(
            w_b.astype(matmul_dtype), xb.astype(matmul_dtype),
            preferred_element_type=jnp.float32)
        return carry

    if B <= 4:
        for b in range(B):                 # tiny B: static unroll, static slices
            batch_body(b, 0)
    else:
        lax.fori_loop(0, B, batch_body, 0)  # larger B: bounded live ranges

    crosspop = cp_ref[...]                                         # (B*N, Dp)

    # mut MLP folded over batch: Linear(D,D) -> ReLU -> Linear(D,D).
    # Weights are untransposed (out, in); contract their dim 1 directly.
    dn = (((1,), (1,)), ((), ()))
    b1 = bias_ref[0:1, :]
    b2 = bias_ref[1:2, :]
    h = lax.dot_general(crosspop.astype(matmul_dtype),
                        w1_ref[...].astype(matmul_dtype),
                        dn, preferred_element_type=jnp.float32) + b1
    h = jnp.maximum(h, 0.0)
    offpop = lax.dot_general(h.astype(matmul_dtype),
                             w2_ref[...].astype(matmul_dtype),
                             dn, preferred_element_type=jnp.float32) + b2

    x = x_ref[...]
    f1 = coef_ref[:, 0:1]
    f2 = coef_ref[:, 1:2]
    f3 = coef_ref[:, 2:3]
    ff = coef_ref[:, 3:4]                                          # parent fitness
    off = f1 * x + f2 * crosspop + f3 * offpop                     # pad lanes stay 0

    # TODO(synk): problem.calfitness is external; synthetic sphere fitness here.
    childfit = jnp.sum(off * off, axis=-1, keepdims=True)          # (B*N, 1)
    # SM(minimize=True): keep parent iff fatherfit < childfit (ties keep child).
    out_ref[...] = jnp.where(ff < childfit, x, off)


def ob_forward(x, fatherfit, params, *, matmul_dtype=jnp.float32):
    """x: (B, N, D) f32 population; fatherfit: (B, N) f32 parent fitness."""
    B, N, D = x.shape
    Dp = ((D + 127) // 128) * 128      # lane-dense feature axis (unmasked stores)
    pad = Dp - D

    # ---- batch-invariant parameter math (done once, in XLA) ----
    Fs = jax.nn.softmax(params['F'])                                # (2,)
    attn_s = Fs[0] * jax.nn.softmax(params['attn'][0], axis=-1)     # (N, N)

    qw = params['qw'][:, 0]                                         # (H,)
    kw = params['kw'][:, 0]
    scale = float(D) ** -0.5           # reference scales by x.shape[-1] == dim
    a_s = scale * jnp.dot(qw, kw)      # coefficient of fitx_n * fitx_m
    c_s = scale * jnp.dot(params['qb'], kw)  # coefficient of fitx_m
    scal = jnp.stack([a_s, c_s, Fs[1], jnp.zeros((), jnp.float32)]).astype(jnp.float32)

    w1 = jnp.pad(params['w1'], ((0, pad), (0, pad)))                # (Dp, Dp)
    w2 = jnp.pad(params['w2'], ((0, pad), (0, pad)))
    bias2 = jnp.pad(jnp.stack([params['b1'], params['b2']]), ((0, 0), (0, pad)))  # (2, Dp)

    # ---- per-call data layout: folded rows, packed small operands ----
    x2d = jnp.pad(x.reshape(B * N, D), ((0, 0), (0, pad)))          # (B*N, Dp)
    attn_fit = jnp.concatenate([attn_s, fatherfit], axis=0)         # (N+B, N)
    rowcoef = jnp.concatenate(
        [jnp.broadcast_to(params['f1'], (B, N, 1)),
         jnp.broadcast_to(params['f2'], (B, N, 1)),
         jnp.broadcast_to(params['f3'], (B, N, 1)),
         fatherfit[..., None]],
        axis=-1).reshape(B * N, 4)                                  # (B*N, 4)

    vmem = pl.BlockSpec(memory_space=pltpu.MemorySpace.VMEM)
    smem = pl.BlockSpec(memory_space=pltpu.MemorySpace.SMEM)

    flops = 2 * B * N * N * Dp + 4 * B * N * Dp * Dp
    transcendentals = B * (N * N + 2 * N)
    bytes_accessed = 4 * (4 + 2 * B * N * Dp + (N + B) * N
                          + 2 * Dp * Dp + 2 * Dp + 4 * B * N)

    out2d = pl.pallas_call(
        functools.partial(ob_kernel, matmul_dtype=matmul_dtype),
        out_shape=jax.ShapeDtypeStruct((B * N, Dp), jnp.float32),
        in_specs=[smem] + [vmem] * 6,
        out_specs=vmem,
        scratch_shapes=[pltpu.VMEM((B * N, Dp), jnp.float32)],
        cost_estimate=pl.CostEstimate(flops=flops,
                                      transcendentals=transcendentals,
                                      bytes_accessed=bytes_accessed),
    )(scal, x2d, attn_fit, w1, w2, bias2, rowcoef)

    return out2d[:, :D].reshape(B, N, D)


def init_params(key, *, dim, hidden_dim, pop_size):
    ks = jax.random.split(key, 13)
    return {
        'attn': jax.random.normal(ks[0], (1, pop_size, pop_size), jnp.float32),
        'qw': jax.random.normal(ks[1], (hidden_dim, 1), jnp.float32) * 0.5,
        'qb': jax.random.normal(ks[2], (hidden_dim,), jnp.float32) * 0.1,
        'kw': jax.random.normal(ks[3], (hidden_dim, 1), jnp.float32) * 0.5,
        'kb': jax.random.normal(ks[4], (hidden_dim,), jnp.float32) * 0.1,  # cancels in softmax
        'F': jax.random.normal(ks[5], (2,), jnp.float32),
        'w1': jax.random.normal(ks[6], (dim, dim), jnp.float32) * dim ** -0.5,
        'b1': jax.random.normal(ks[7], (dim,), jnp.float32) * 0.1,
        'w2': jax.random.normal(ks[8], (dim, dim), jnp.float32) * dim ** -0.5,
        'b2': jax.random.normal(ks[9], (dim,), jnp.float32) * 0.1,
        'f1': jax.random.normal(ks[10], (1, pop_size, 1), jnp.float32),
        'f2': jax.random.normal(ks[11], (1, pop_size, 1), jnp.float32),
        'f3': jax.random.normal(ks[12], (1, pop_size, 1), jnp.float32),
    }


if __name__ == "__main__":
    B, N, D, H = 2, 8, 32, 32   # batch, popSize, dim, hidden_dim

    key = jax.random.PRNGKey(0)
    kx, kp = jax.random.split(key)
    x = jax.random.normal(kx, (B, N, D), jnp.float32)

    # synthetic sphere fitness for the parent population (problem.calfitness)
    fatherfit = jnp.sum(x * x, axis=-1)                   # (B, N)

    params = init_params(kp, dim=D, hidden_dim=H, pop_size=N)

    out = jax.jit(ob_forward)(x, fatherfit, params)
    jax.block_until_ready(out)
    assert out.shape == (B, N, D) and out.dtype == jnp.float32
    print("KERNEL_OK")
</pallas_src>

<mosaic_0001>
module attributes {stable_mosaic.version = 11 : i64} {
  func.func @ob_kernel(%arg0: memref<4xf32, #tpu.memory_space<smem>>, %arg1: memref<16x128xf32, #tpu.memory_space<vmem>>, %arg2: memref<10x8xf32, #tpu.memory_space<vmem>>, %arg3: memref<128x128xf32, #tpu.memory_space<vmem>>, %arg4: memref<128x128xf32, #tpu.memory_space<vmem>>, %arg5: memref<2x128xf32, #tpu.memory_space<vmem>>, %arg6: memref<16x4xf32, #tpu.memory_space<vmem>>, %arg7: memref<16x128xf32, #tpu.memory_space<vmem>>, %arg8: memref<16x128xf32, #tpu.memory_space<vmem>>) attributes {dimension_semantics = [], scalar_prefetch = 0 : i64, scratch_operands = 1 : i64, tpu.core_type = #tpu.core_type<tc>} {
    %c0 = arith.constant 0 : index
    %0 = memref.load %arg0[%c0] : memref<4xf32, #tpu.memory_space<smem>>
    %c1 = arith.constant 1 : index
    %1 = memref.load %arg0[%c1] : memref<4xf32, #tpu.memory_space<smem>>
    %c2 = arith.constant 2 : index
    %2 = memref.load %arg0[%c2] : memref<4xf32, #tpu.memory_space<smem>>
    %c0_0 = arith.constant 0 : index
    %c0_1 = arith.constant 0 : index
    %3 = vector.load %arg2[%c0_0, %c0_1] : memref<10x8xf32, #tpu.memory_space<vmem>>, vector<8x8xf32>
    %c8 = arith.constant 8 : index
    %c0_2 = arith.constant 0 : index
    %4 = vector.load %arg2[%c8, %c0_2] : memref<10x8xf32, #tpu.memory_space<vmem>>, vector<1x8xf32>
    %cst = arith.constant dense<0xFF800000> : vector<1xf32>
    %5 = vector.multi_reduction <maximumf>, %4, %cst [1] : vector<1x8xf32> to vector<1xf32>
    %6 = vector.shape_cast %5 : vector<1xf32> to vector<1x1xf32>
    %7 = vector.broadcast %6 : vector<1x1xf32> to vector<1x8xf32>
    %8 = arith.subf %4, %7 : vector<1x8xf32>
    %9 = math.exp %8 : vector<1x8xf32>
    %cst_3 = arith.constant dense<0.000000e+00> : vector<1xf32>
    %10 = vector.multi_reduction <add>, %9, %cst_3 [1] : vector<1x8xf32> to vector<1xf32>
    %11 = vector.shape_cast %10 : vector<1xf32> to vector<1x1xf32>
    %12 = tpu.reciprocal %11 {approx = true} : vector<1x1xf32> -> vector<1x1xf32>
    %13 = vector.broadcast %12 : vector<1x1xf32> to vector<1x8xf32>
    %14 = arith.mulf %9, %13 : vector<1x8xf32>
    %c0_4 = arith.constant 0 : index
    %c3 = arith.constant 3 : index
    %15 = vector.load %arg6[%c0_4, %c3] : memref<16x4xf32, #tpu.memory_space<vmem>>, vector<8x1xf32>
    %16 = vector.broadcast %6 : vector<1x1xf32> to vector<8x1xf32>
    %17 = arith.subf %15, %16 : vector<8x1xf32>
    %18 = math.exp %17 : vector<8x1xf32>
    %19 = vector.broadcast %12 : vector<1x1xf32> to vector<8x1xf32>
    %20 = arith.mulf %18, %19 : vector<8x1xf32>
    %21 = vector.broadcast %0 : f32 to vector<8x1xf32>
    %22 = arith.mulf %21, %20 : vector<8x1xf32>
    %23 = vector.broadcast %1 : f32 to vector<8x1xf32>
    %24 = arith.addf %22, %23 : vector<8x1xf32>
    %25 = vector.broadcast %24 : vector<8x1xf32> to vector<8x8xf32>
    %26 = vector.broadcast %14 : vector<1x8xf32> to vector<8x8xf32>
    %27 = arith.mulf %25, %26 : vector<8x8xf32>
    %cst_5 = arith.constant dense<0xFF800000> : vector<8xf32>
    %28 = vector.multi_reduction <maximumf>, %27, %cst_5 [1] : vector<8x8xf32> to vector<8xf32>
    %29 = vector.shape_cast %28 : vector<8xf32> to vector<8x1xf32>
    %30 = vector.broadcast %29 : vector<8x1xf32> to vector<8x8xf32>
    %31 = arith.subf %27, %30 : vector<8x8xf32>
    %32 = math.exp %31 : vector<8x8xf32>
    %cst_6 = arith.constant dense<0.000000e+00> : vector<8xf32>
    %33 = vector.multi_reduction <add>, %32, %cst_6 [1] : vector<8x8xf32> to vector<8xf32>
    %34 = vector.shape_cast %33 : vector<8xf32> to vector<8x1xf32>
    %35 = tpu.reciprocal %34 {approx = true} : vector<8x1xf32> -> vector<8x1xf32>
    %36 = vector.broadcast %35 : vector<8x1xf32> to vector<8x8xf32>
    %37 = arith.mulf %32, %36 : vector<8x8xf32>
    %38 = vector.broadcast %2 : f32 to vector<8x8xf32>
    %39 = arith.mulf %38, %37 : vector<8x8xf32>
    %40 = arith.addf %3, %39 : vector<8x8xf32>
    %c0_7 = arith.constant 0 : index
    %c0_8 = arith.constant 0 : index
    %41 = vector.load %arg1[%c0_7, %c0_8] : memref<16x128xf32, #tpu.memory_space<vmem>>, vector<8x128xf32>
    %cst_9 = arith.constant dense<0.000000e+00> : vector<8x128xf32>
    %42 = tpu.matmul %40, %41, %cst_9 {dimension_numbers = #tpu.dot_dimension_numbers<[1], [0], [0], [1], [0, 0, 1, 1], [], []>} : vector<8x8xf32>, vector<8x128xf32>, vector<8x128xf32> -> vector<8x128xf32>
    %c0_10 = arith.constant 0 : index
    %c0_11 = arith.constant 0 : index
    %43 = vector.load %arg8[%c0_10, %c0_11] : memref<16x128xf32, #tpu.memory_space<vmem>>, vector<8x128xf32>
    tpu.vector_store %arg8[%c0_10, %c0_11], %42 {strides = array<i32>} : memref<16x128xf32, #tpu.memory_space<vmem>>, vector<8x128xf32>,
    %c9 = arith.constant 9 : index
    %c0_12 = arith.constant 0 : index
    %44 = vector.load %arg2[%c9, %c0_12] : memref<10x8xf32, #tpu.memory_space<vmem>>, vector<1x8xf32>
    %cst_13 = arith.constant dense<0xFF800000> : vector<1xf32>
    %45 = vector.multi_reduction <maximumf>, %44, %cst_13 [1] : vector<1x8xf32> to vector<1xf32>
    %46 = vector.shape_cast %45 : vector<1xf32> to vector<1x1xf32>
    %47 = vector.broadcast %46 : vector<1x1xf32> to vector<1x8xf32>
    %48 = arith.subf %44, %47 : vector<1x8xf32>
    %49 = math.exp %48 : vector<1x8xf32>
    %cst_14 = arith.constant dense<0.000000e+00> : vector<1xf32>
    %50 = vector.multi_reduction <add>, %49, %cst_14 [1] : vector<1x8xf32> to vector<1xf32>
    %51 = vector.shape_cast %50 : vector<1xf32> to vector<1x1xf32>
    %52 = tpu.reciprocal %51 {approx = true} : vector<1x1xf32> -> vector<1x1xf32>
    %53 = vector.broadcast %52 : vector<1x1xf32> to vector<1x8xf32>
    %54 = arith.mulf %49, %53 : vector<1x8xf32>
    %c8_15 = arith.constant 8 : index
    %c3_16 = arith.constant 3 : index
    %55 = vector.load %arg6[%c8_15, %c3_16] : memref<16x4xf32, #tpu.memory_space<vmem>>, vector<8x1xf32>
    %56 = vector.broadcast %46 : vector<1x1xf32> to vector<8x1xf32>
    %57 = arith.subf %55, %56 : vector<8x1xf32>
    %58 = math.exp %57 : vector<8x1xf32>
    %59 = vector.broadcast %52 : vector<1x1xf32> to vector<8x1xf32>
    %60 = arith.mulf %58, %59 : vector<8x1xf32>
    %61 = vector.broadcast %0 : f32 to vector<8x1xf32>
    %62 = arith.mulf %61, %60 : vector<8x1xf32>
    %63 = vector.broadcast %1 : f32 to vector<8x1xf32>
    %64 = arith.addf %62, %63 : vector<8x1xf32>
    %65 = vector.broadcast %64 : vector<8x1xf32> to vector<8x8xf32>
    %66 = vector.broadcast %54 : vector<1x8xf32> to vector<8x8xf32>
    %67 = arith.mulf %65, %66 : vector<8x8xf32>
    %cst_17 = arith.constant dense<0xFF800000> : vector<8xf32>
    %68 = vector.multi_reduction <maximumf>, %67, %cst_17 [1] : vector<8x8xf32> to vector<8xf32>
    %69 = vector.shape_cast %68 : vector<8xf32> to vector<8x1xf32>
    %70 = vector.broadcast %69 : vector<8x1xf32> to vector<8x8xf32>
    %71 = arith.subf %67, %70 : vector<8x8xf32>
    %72 = math.exp %71 : vector<8x8xf32>
    %cst_18 = arith.constant dense<0.000000e+00> : vector<8xf32>
    %73 = vector.multi_reduction <add>, %72, %cst_18 [1] : vector<8x8xf32> to vector<8xf32>
    %74 = vector.shape_cast %73 : vector<8xf32> to vector<8x1xf32>
    %75 = tpu.reciprocal %74 {approx = true} : vector<8x1xf32> -> vector<8x1xf32>
    %76 = vector.broadcast %75 : vector<8x1xf32> to vector<8x8xf32>
    %77 = arith.mulf %72, %76 : vector<8x8xf32>
    %78 = vector.broadcast %2 : f32 to vector<8x8xf32>
    %79 = arith.mulf %78, %77 : vector<8x8xf32>
    %80 = arith.addf %3, %79 : vector<8x8xf32>
    %c8_19 = arith.constant 8 : index
    %c0_20 = arith.constant 0 : index
    %81 = vector.load %arg1[%c8_19, %c0_20] : memref<16x128xf32, #tpu.memory_space<vmem>>, vector<8x128xf32>
    %cst_21 = arith.constant dense<0.000000e+00> : vector<8x128xf32>
    %82 = tpu.matmul %80, %81, %cst_21 {dimension_numbers = #tpu.dot_dimension_numbers<[1], [0], [0], [1], [0, 0, 1, 1], [], []>} : vector<8x8xf32>, vector<8x128xf32>, vector<8x128xf32> -> vector<8x128xf32>
    %c8_22 = arith.constant 8 : index
    %c0_23 = arith.constant 0 : index
    %83 = vector.load %arg8[%c8_22, %c0_23] : memref<16x128xf32, #tpu.memory_space<vmem>>, vector<8x128xf32>
    tpu.vector_store %arg8[%c8_22, %c0_23], %82 {strides = array<i32>} : memref<16x128xf32, #tpu.memory_space<vmem>>, vector<8x128xf32>,
    %c0_24 = arith.constant 0 : index
    %c0_25 = arith.constant 0 : index
    %84 = vector.load %arg8[%c0_24, %c0_25] : memref<16x128xf32, #tpu.memory_space<vmem>>, vector<16x128xf32>
    %c0_26 = arith.constant 0 : index
    %c0_27 = arith.constant 0 : index
    %85 = vector.load %arg5[%c0_26, %c0_27] : memref<2x128xf32, #tpu.memory_space<vmem>>, vector<1x128xf32>
    %c1_28 = arith.constant 1 : index
    %c0_29 = arith.constant 0 : index
    %86 = vector.load %arg5[%c1_28, %c0_29] : memref<2x128xf32, #tpu.memory_space<vmem>>, vector<1x128xf32>
    %c0_30 = arith.constant 0 : index
    %c0_31 = arith.constant 0 : index
    %87 = vector.load %arg3[%c0_30, %c0_31] : memref<128x128xf32, #tpu.memory_space<vmem>>, vector<128x128xf32>
    %cst_32 = arith.constant dense<0.000000e+00> : vector<16x128xf32>
    %88 = tpu.matmul %84, %87, %cst_32 {dimension_numbers = #tpu.dot_dimension_numbers<[1], [1], [0], [0], [0, 0, 1, 0], [], []>} : vector<16x128xf32>, vector<128x128xf32>, vector<16x128xf32> -> vector<16x128xf32>
    %89 = vector.broadcast %85 : vector<1x128xf32> to vector<16x128xf32>
    %90 = arith.addf %88, %89 : vector<16x128xf32>
    %cst_33 = arith.constant 0.000000e+00 : f32
    %91 = vector.broadcast %cst_33 : f32 to vector<16x128xf32>
    %92 = arith.maximumf %90, %91 : vector<16x128xf32>
    %c0_34 = arith.constant 0 : index
    %c0_35 = arith.constant 0 : index
    %93 = vector.load %arg4[%c0_34, %c0_35] : memref<128x128xf32, #tpu.memory_space<vmem>>, vector<128x128xf32>
    %cst_36 = arith.constant dense<0.000000e+00> : vector<16x128xf32>
    %94 = tpu.matmul %92, %93, %cst_36 {dimension_numbers = #tpu.dot_dimension_numbers<[1], [1], [0], [0], [0, 0, 1, 0], [], []>} : vector<16x128xf32>, vector<128x128xf32>, vector<16x128xf32> -> vector<16x128xf32>
    %95 = vector.broadcast %86 : vector<1x128xf32> to vector<16x128xf32>
    %96 = arith.addf %94, %95 : vector<16x128xf32>
    %c0_37 = arith.constant 0 : index
    %c0_38 = arith.constant 0 : index
    %97 = vector.load %arg1[%c0_37, %c0_38] : memref<16x128xf32, #tpu.memory_space<vmem>>, vector<16x128xf32>
    %c0_39 = arith.constant 0 : index
    %c0_40 = arith.constant 0 : index
    %98 = vector.load %arg6[%c0_39, %c0_40] : memref<16x4xf32, #tpu.memory_space<vmem>>, vector<16x1xf32>
    %c0_41 = arith.constant 0 : index
    %c1_42 = arith.constant 1 : index
    %99 = vector.load %arg6[%c0_41, %c1_42] : memref<16x4xf32, #tpu.memory_space<vmem>>, vector<16x1xf32>
    %c0_43 = arith.constant 0 : index
    %c2_44 = arith.constant 2 : index
    %100 = vector.load %arg6[%c0_43, %c2_44] : memref<16x4xf32, #tpu.memory_space<vmem>>, vector<16x1xf32>
    %c0_45 = arith.constant 0 : index
    %c3_46 = arith.constant 3 : index
    %101 = vector.load %arg6[%c0_45, %c3_46] : memref<16x4xf32, #tpu.memory_space<vmem>>, vector<16x1xf32>
    %102 = vector.broadcast %98 : vector<16x1xf32> to vector<16x128xf32>
    %103 = arith.mulf %102, %97 : vector<16x128xf32>
    %104 = vector.broadcast %99 : vector<16x1xf32> to vector<16x128xf32>
    %105 = arith.mulf %104, %84 : vector<16x128xf32>
    %106 = arith.addf %103, %105 : vector<16x128xf32>
    %107 = vector.broadcast %100 : vector<16x1xf32> to vector<16x128xf32>
    %108 = arith.mulf %107, %96 : vector<16x128xf32>
    %109 = arith.addf %106, %108 : vector<16x128xf32>
    %110 = arith.mulf %109, %109 : vector<16x128xf32>
    %cst_47 = arith.constant dense<0.000000e+00> : vector<16xf32>
    %111 = vector.multi_reduction <add>, %110, %cst_47 [1] : vector<16x128xf32> to vector<16xf32>
    %112 = vector.shape_cast %111 : vector<16xf32> to vector<16x1xf32>
    %113 = arith.cmpf olt, %101, %112 : vector<16x1xf32>
    %114 = vector.shape_cast %113 : vector<16x1xi1> to vector<16x1xi1>
    %115 = vector.broadcast %114 : vector<16x1xi1> to vector<16x128xi1>
    %116 = arith.select %115, %97, %109 : vector<16x128xi1>, vector<16x128xf32>
    %c0_48 = arith.constant 0 : index
    %c0_49 = arith.constant 0 : index
    %117 = vector.load %arg7[%c0_48, %c0_49] : memref<16x128xf32, #tpu.memory_space<vmem>>, vector<16x128xf32>
    tpu.vector_store %arg7[%c0_48, %c0_49], %116 {strides = array<i32>} : memref<16x128xf32, #tpu.memory_space<vmem>>, vector<16x128xf32>,
    return
  }
}

</mosaic_0001>

<bundles_post_ra>
// kernel: ob_forward.1
= control target key start
LH: loop header
LB: loop body
LE: loop exit
PB: predicated region body
PF: predicated region fallthrough
CT: control target
= control target key end

     0   :  { %12 = vsyncpa [#allocation4], 0  ;;  %s957_s0 = inlined_call_operand.vmem [shape: f32[4], index: 0, kind: input, shape index: {}]   ;;  %s958_s1 = inlined_call_operand.vmem [shape: f32[16,128], index: 1, kind: input, shape index: {}]   ;;  %s959_s2 = inlined_call_operand.vmem [shape: f32[10,8], index: 2, kind: input, shape index: {}]   ;;  %s960_s3 = inlined_call_operand.vmem [shape: f32[128,128], index: 3, kind: input, shape index: {}]   ;;  %s961_s4 = inlined_call_operand.vmem [shape: f32[128,128], index: 4, kind: input, shape index: {}]   ;;  %s962_s5 = inlined_call_operand.vmem [shape: f32[2,128], index: 5, kind: input, shape index: {}]   ;;  %s963_s6 = inlined_call_operand.vmem [shape: f32[16,4], index: 6, kind: input, shape index: {}]   ;;  %s964_s7 = inlined_call_operand.vmem [shape: f32[16,128], index: 7, kind: output, shape index: {}]  }
   0x1   :  { %s19_s26 = sshll.u32 %s957_s0, 4  ;;  %s20_s26 = int_to_ptr.vmem [resolvable:$true] %s19_s26 }
   0x2   :  { %s722_s27 = scalar_lea.vmem %s20_s26, 16  ;;  %p727_p1 = scmp.lt.s32.totalorder %s20_s26, %s20_s26 }
   0x3   :  { %p723_p0 = scmp.ne.s32.totalorder %s20_s26, %s722_s27  ;;  %p728_p2 = scmp.lt.s32.totalorder %s722_s27, %s722_s27 }
   0x5   :  { %p729_p3 = por %p728_p2, %p727_p1 }
   0x7   :  { %p730_p4 = pnand %p729_p3, %p723_p0 }
   0x9   :  { %733 = shalt.err (!%p730_p4)
}
   0xa   :  { %s736_s28 = smov [#allocation3]  }
   0xb   :  { %22 = dma.vmem_to_smem %s20_s26, 16, %s736_s28, [#allocation4]  }
   0xc   :  { %734 = dma.done.wait [#allocation4], 16  }
   0xd   :  { %735 = vsyncadd [#allocation4], 4294967280 }
   0xe   :  { %38 = sfence }
   0xf   :  { %v43_v0 = vld [vmem:[%s959_s2 + $0x8] sm:$0x1]  ;;  %vm44_vm0 = vcmask 57344   ;;  %v173_v1 = vld [vmem:[%s959_s2 + $0x9] sm:$0x1]  ;;  %v737_v14 = vmov 3   ;;  %v57_v15 = vlaneseq }
  0x10   :  { %v45_v2 = vsel %vm44_vm0, %v43_v0, -inf  ;;  %v174_v3 = vsel %vm44_vm0, %v173_v1, -inf  ;;  %694 = vset.pattern.permute.xlu0 %v737_v14  ;;  %695 = vset.pattern.permute.xlu1 %v737_v14  ;;  %v801_v19 = vld [vmem:[%s963_s6] sm:$0xff]  ;;  %v807_v22 = vld [vmem:[%s963_s6 + $0x8] sm:$0xff]  ;;  %s39_s13 = sld [smem:[#allocation3]]  ;;  %vm83_vm1 = vcmask 64512  }
  0x11   :  { %46 = vmax.xlane.f32.xlu0 %v45_v2  ;;  %v58_v16 = vshrl.u32 %v57_v15, 7  ;;  %s561_s14 = sld [smem:[#allocation3 + $0x1]]  ;;  %v817_v62 = vld [vmem:[%s958_s1] sm:$0xff]  ;;  %v738_v63 = vmov 0.0   ;;  %vm739_vm2 = vmmov 0   ;;  %v740_v2 = vmov 0  }
  0x12   :  { %607 = vmatprep.subr.mxu0 %v738_v63  ;;  %609 = vmatprep.mubr.msk.f32.mxu0 %vm739_vm2, %v738_v63  ;;  %v316_v15 = vld [vmem:[%s960_s3 + $0x70] sm:$0xff] }
  0x13   :  { %v59_v17 = vsub.s32 0, %v58_v16  ;;  %608 = vmatpush3.msra.mxu0 %v817_v62  ;;  %612 = vmatprep.subr.mxu1 %v738_v63 }
  0x14   :  { %614 = vmatprep.mubr.msk.f32.mxu1 %vm739_vm2, %v738_v63 }
  0x15   :  { %175 = vmax.xlane.f32.xlu0 %v174_v3  ;;  %v741_v3 = vmov 1  }
  0x16   :  { %v69_v31 = vstv %s39_s13 }
  0x17   :  { %v71_v34 = vstv %s561_s14 }
  0x9a   :  { %v47_v4 = vpop.xlane.xlu0 %46 }
  0x9b   :  { %v48_v5 = vsub.f32 %v43_v0, %v47_v4  ;;  %v60_v18 = vrot.slane %v47_v4, %v59_v17  ;;  %v823_v0 = vld [vmem:[%s958_s1 + $0x8] sm:$0xff]  ;;  %s562_s1 = sld [smem:[#allocation3 + $0x2]] }
  0x9c   :  { %613 = vmatpush3.msra.mxu1 %v823_v0 }
  0x9d   :  { %v49_v6 = vmul.f32 1.442695, %v48_v5  ;;  %v61_v20 = vsub.f32 %v801_v19, %v60_v18  ;;  %v315_v18 = vld [vmem:[%s960_s3 + $0x68] sm:$0xff] }
  0x9e   :  { %v176_v7 = vpop.xlane.xlu0 %175 }
  0x9f   :  { %702 = vpow2.f32 %v49_v6  ;;  %v177_v8 = vsub.f32 %v173_v1, %v176_v7  ;;  %v189_v21 = vrot.slane %v176_v7, %v59_v17  ;;  %v62_v23 = vmul.f32 1.442695, %v61_v20  ;;  %v317_v1 = vld [vmem:[%s960_s3 + $0x78] sm:$0xff]  ;;  %v314_v20 = vld [vmem:[%s960_s3 + $0x60] sm:$0xff] }
  0xa0   :  { %617 = vmatprep.subr.mxu0 %v317_v1 }
  0xa1   :  { %v178_v9 = vmul.f32 1.442695, %v177_v8  ;;  %v190_v24 = vsub.f32 %v807_v22, %v189_v21  ;;  %v95_v7 = vstv %s562_s1  ;;  %v313_v21 = vld [vmem:[%s960_s3 + $0x58] sm:$0xff] }
  0xa3   :  { %704 = vpow2.f32 %v178_v9  ;;  %v191_v26 = vmul.f32 1.442695, %v190_v24  ;;  %v42_v9 = vld [vmem:[%s959_s2] sm:$0xff]  ;;  %v311_v24 = vld [vmem:[%s960_s3 + $0x48] sm:$0xff] }
  0xac   :  { %v703_v10 = vpop.eup %702 }
  0xad   :  { %v51_v11 = vsel %vm44_vm0, %v703_v10, 0.0 }
  0xae   :  { %52 = vadd.xlane.f32.xlu1 %v51_v11 }
  0xb0   :  { %v705_v12 = vpop.eup %704 }
  0xb1   :  { %v180_v13 = vsel %vm44_vm0, %v705_v12, 0.0 }
  0xb2   :  { %181 = vadd.xlane.f32.xlu1 %v180_v13 }
 0x137   :  { %v53_v25 = vpop.xlane.xlu1 %52 }
 0x138   :  { %706 = vrcp.f32 %v53_v25  ;;  %v310_v25 = vld [vmem:[%s960_s3 + $0x40] sm:$0xff] }
 0x139   :  { %708 = vpow2.f32 %v62_v23  ;;  %v312_v23 = vld [vmem:[%s960_s3 + $0x50] sm:$0xff] }
 0x13b   :  { %v182_v27 = vpop.xlane.xlu1 %181 }
 0x13c   :  { %710 = vrcp.f32 %v182_v27  ;;  %v308_v27 = vld [vmem:[%s960_s3 + $0x30] sm:$0xff] }
 0x13d   :  { %712 = vpow2.f32 %v191_v26  ;;  %v309_v26 = vld [vmem:[%s960_s3 + $0x38] sm:$0xff] }
 0x145   :  { %v707_v28 = vpop.eup %706 }
 0x146   :  { %v67_v29 = vrot.slane %v707_v28, %v59_v17  ;;  %v709_v30 = vpop.eup %708  ;;  %v55_v42 = vmul.f32 %v707_v28, %v703_v10  ;;  %v307_v28 = vld [vmem:[%s960_s3 + $0x28] sm:$0xff] }
 0x148   :  { %v68_v32 = vmul.f32 %v709_v30, %v67_v29  ;;  %v81_v43 = vrot.slane %v55_v42, %v59_v17  ;;  %v306_v29 = vld [vmem:[%s960_s3 + $0x20] sm:$0xff]  ;;  %v305_v30 = vld [vmem:[%s960_s3 + $0x18] sm:$0xff] }
 0x149   :  { %v711_v33 = vpop.eup %710  ;;  %v406_v42 = vld [vmem:[%s961_s4 + $0x38] sm:$0xff] }
 0x14a   :  { %v70_v35 = vmul.f32 %v69_v31, %v68_v32  ;;  %v196_v36 = vrot.slane %v711_v33, %v59_v17  ;;  %v713_v37 = vpop.eup %712  ;;  %v184_v44 = vmul.f32 %v711_v33, %v705_v12  ;;  %v303_v32 = vld [vmem:[%s960_s3 + $0x8] sm:$0xff]  ;;  %v302_v33 = vld [vmem:[%s960_s3] sm:$0xff] }
 0x14c   :  { %v72_v38 = vadd.f32 %v71_v34, %v70_v35  ;;  %v197_v39 = vmul.f32 %v713_v37, %v196_v36  ;;  %v208_v47 = vrot.slane %v184_v44, %v59_v17  ;;  %v413_v35 = vld [vmem:[%s961_s4 + $0x70] sm:$0xff]  ;;  %v412_v36 = vld [vmem:[%s961_s4 + $0x68] sm:$0xff]  ;;  %v411_v37 = vld [vmem:[%s961_s4 + $0x60] sm:$0xff] }
 0x14d   :  { %v404_v44 = vld [vmem:[%s961_s4 + $0x28] sm:$0xff] }
 0x14e   :  { %75 = vperm.xlu0 %694, %v72_v38   ;;  %v198_v40 = vmul.f32 %v197_v39, %v69_v31  ;;  %v304_v31 = vld [vmem:[%s960_s3 + $0x10] sm:$0xff]  ;;  %v410_v38 = vld [vmem:[%s961_s4 + $0x58] sm:$0xff] }
 0x14f   :  { %v409_v39 = vld [vmem:[%s961_s4 + $0x50] sm:$0xff] }
 0x150   :  { %v199_v41 = vadd.f32 %v198_v40, %v71_v34  ;;  %v414_v34 = vld [vmem:[%s961_s4 + $0x78] sm:$0xff]  ;;  %v408_v40 = vld [vmem:[%s961_s4 + $0x48] sm:$0xff] }
 0x151   :  { %652 = vmatprep.subr.mxu1 %v414_v34 }
 0x152   :  { %202 = vperm.xlu1 %695, %v199_v41   ;;  %697 = vset.pattern.permute.xlu0 %v740_v2  ;;  %v407_v41 = vld [vmem:[%s961_s4 + $0x40] sm:$0xff] }
 0x156   :  { %696 = vset.pattern.permute.xlu1 %v740_v2 }
 0x1c9   :  { %v76_v45 = vpop.permute.xlu0 %75 }
 0x1ca   :  { %v82_v46 = vmul.f32 %v81_v43, %v76_v45  ;;  %v405_v43 = vld [vmem:[%s961_s4 + $0x30] sm:$0xff]  ;;  %v403_v45 = vld [vmem:[%s961_s4 + $0x20] sm:$0xff] }
 0x1cc   :  { %v84_v48 = vsel %vm83_vm1, %v82_v46, -inf }
 0x1cd   :  { %v203_v49 = vpop.permute.xlu1 %202  ;;  %85 = vmax.xlane.f32.xlu1 %v84_v48 }
 0x1ce   :  { %v209_v50 = vmul.f32 %v208_v47, %v203_v49  ;;  %v401_v47 = vld [vmem:[%s961_s4 + $0x10] sm:$0xff] }
 0x1d0   :  { %v210_v51 = vsel %vm83_vm1, %v209_v50, -inf }
 0x1d1   :  { %211 = vmax.xlane.f32.xlu0 %v210_v51 }
 0x1e7   :  { %505 = vperm.xlu0 %697, %v807_v22  }
 0x1eb   :  { %701 = vset.pattern.permute.xlu0 %v737_v14 }
 0x256   :  { %v86_v52 = vpop.xlane.xlu1 %85 }
 0x257   :  { %v87_v53 = vsub.f32 %v82_v46, %v86_v52  ;;  %v402_v46 = vld [vmem:[%s961_s4 + $0x18] sm:$0xff]  ;;  %v400_v52 = vld [vmem:[%s961_s4 + $0x8] sm:$0xff] }
 0x259   :  { %v88_v54 = vmul.f32 1.442695, %v87_v53  ;;  %v399_v53 = vld [vmem:[%s961_s4] sm:$0xff] }
 0x25a   :  { %v212_v55 = vpop.xlane.xlu0 %211 }
 0x25b   :  { %714 = vpow2.f32 %v88_v54  ;;  %v213_v56 = vsub.f32 %v209_v50, %v212_v55  ;;  %v742_v54 = vmov 2   ;;  %v565_v55 = vld [vmem:[%s962_s5] ss:$0 sm:$0xff] }
 0x25d   :  { %v214_v57 = vmul.f32 1.442695, %v213_v56 }
 0x25f   :  { %716 = vpow2.f32 %v214_v57 }
 0x268   :  { %v715_v58 = vpop.eup %714 }
 0x269   :  { %v90_v59 = vsel %vm83_vm1, %v715_v58, 0.0 }
 0x26a   :  { %91 = vadd.xlane.f32.xlu1 %v90_v59 }
 0x26c   :  { %v717_v60 = vpop.eup %716 }
 0x26d   :  { %v216_v61 = vsel %vm83_vm1, %v717_v60, 0.0 }
 0x26e   :  { %217 = vadd.xlane.f32.xlu1 %v216_v61 }
 0x27f   :  { %500 = vperm.xlu1 %696, %v801_v19  }
 0x283   :  { %698 = vset.pattern.permute.xlu1 %v741_v3 }
 0x284   :  { %511 = vperm.xlu1 %698, %v801_v19  }
 0x288   :  { %515 = vperm.xlu1 %698, %v807_v22  }
 0x28c   :  { %699 = vset.pattern.permute.xlu1 %v742_v54 }
 0x28d   :  { %523 = vperm.xlu1 %699, %v801_v19  }
 0x291   :  { %527 = vperm.xlu1 %699, %v807_v22  }
 0x295   :  { %700 = vset.pattern.permute.xlu1 %v737_v14  ;;  %v566_v14 = vld [vmem:[%s962_s5 + $0x1] ss:$0 sm:$0xff] }
 0x2f3   :  { %v92_v4 = vpop.xlane.xlu1 %91 }
 0x2f4   :  { %718 = vrcp.f32 %v92_v4 }
 0x2f7   :  { %v218_v5 = vpop.xlane.xlu1 %217 }
 0x2f8   :  { %720 = vrcp.f32 %v218_v5  ;;  %v506_v5 = vpop.permute.xlu0 %505 }
 0x2fb   :  { %v501_v63 = vpop.permute.xlu1 %500 }
 0x301   :  { %v719_v6 = vpop.eup %718 }
 0x302   :  { %v94_v8 = vmul.f32 %v719_v6, %v715_v58 }
 0x304   :  { %v96_v10 = vmul.f32 %v95_v7, %v94_v8 }
 0x305   :  { %v721_v11 = vpop.eup %720 }
 0x306   :  { %v97_v12 = vadd.f32 %v96_v10, %v42_v9  ;;  %v220_v13 = vmul.f32 %v721_v11, %v717_v60  ;;  %v508_v10 = vmul.f32 %v501_v63, %v817_v62 }
 0x308   :  { %610 = vmatmul.mubr.msk.f32.vlgmr.msra.gmra.mxu0 %vm83_vm1, %v97_v12  ;;  %v221_v16 = vmul.f32 %v220_v13, %v95_v7  ;;  %v509_v7 = vmul.f32 %v506_v5, %v823_v0 }
 0x309   :  { %618 = vmatpush3.xpose.msra.mxu0 %v317_v1  ;;  %v512_v1 = vpop.permute.xlu1 %511 }
 0x30a   :  { %v222_v17 = vadd.f32 %v221_v16, %v42_v9  ;;  %619 = vmatprep.subr.mxu0 %v316_v15 }
 0x30c   :  { %615 = vmatmul.mubr.msk.f32.vlgmr.msra.gmra.mxu1 %vm83_vm1, %v222_v17 }
 0x30d   :  { %620 = vmatpush3.xpose.msra.mxu0 %v316_v15  ;;  %653 = vmatpush3.xpose.msra.mxu1 %v414_v34  ;;  %v516_v3 = vpop.permute.xlu1 %515 }
 0x30e   :  { %621 = vmatprep.subr.mxu0 %v315_v18  ;;  %654 = vmatprep.subr.mxu1 %v413_v35 }
 0x311   :  { %622 = vmatpush3.xpose.msra.mxu0 %v315_v18  ;;  %655 = vmatpush3.xpose.msra.mxu1 %v413_v35  ;;  %v524_v4 = vpop.permute.xlu1 %523 }
 0x312   :  { %623 = vmatprep.subr.mxu0 %v314_v20  ;;  %656 = vmatprep.subr.mxu1 %v412_v36 }
 0x315   :  { %624 = vmatpush3.xpose.msra.mxu0 %v314_v20  ;;  %657 = vmatpush3.xpose.msra.mxu1 %v412_v36  ;;  %v528_v9 = vpop.permute.xlu1 %527 }
 0x316   :  { %625 = vmatprep.subr.mxu0 %v313_v21  ;;  %658 = vmatprep.subr.mxu1 %v411_v37 }
 0x319   :  { %626 = vmatpush3.xpose.msra.mxu0 %v313_v21  ;;  %659 = vmatpush3.xpose.msra.mxu1 %v411_v37 }
 0x31a   :  { %627 = vmatprep.subr.mxu0 %v312_v23  ;;  %660 = vmatprep.subr.mxu1 %v410_v38 }
 0x31d   :  { %628 = vmatpush3.xpose.msra.mxu0 %v312_v23  ;;  %661 = vmatpush3.xpose.msra.mxu1 %v410_v38 }
 0x31e   :  { %629 = vmatprep.subr.mxu0 %v311_v24  ;;  %662 = vmatprep.subr.mxu1 %v409_v39 }
 0x321   :  { %630 = vmatpush3.xpose.msra.mxu0 %v311_v24  ;;  %663 = vmatpush3.xpose.msra.mxu1 %v409_v39 }
 0x322   :  { %631 = vmatprep.subr.mxu0 %v310_v25  ;;  %664 = vmatprep.subr.mxu1 %v408_v40 }
 0x325   :  { %632 = vmatpush3.xpose.msra.mxu0 %v310_v25  ;;  %665 = vmatpush3.xpose.msra.mxu1 %v408_v40 }
 0x326   :  { %633 = vmatprep.subr.mxu0 %v309_v26  ;;  %666 = vmatprep.subr.mxu1 %v407_v41 }
 0x329   :  { %634 = vmatpush3.xpose.msra.mxu0 %v309_v26  ;;  %667 = vmatpush3.xpose.msra.mxu1 %v407_v41 }
 0x32a   :  { %635 = vmatprep.subr.mxu0 %v308_v27  ;;  %668 = vmatprep.subr.mxu1 %v406_v42 }
 0x32d   :  { %636 = vmatpush3.xpose.msra.mxu0 %v308_v27  ;;  %669 = vmatpush3.xpose.msra.mxu1 %v406_v42 }
 0x32e   :  { %637 = vmatprep.subr.mxu0 %v307_v28  ;;  %670 = vmatprep.subr.mxu1 %v405_v43 }
 0x331   :  { %638 = vmatpush3.xpose.msra.mxu0 %v307_v28  ;;  %671 = vmatpush3.xpose.msra.mxu1 %v405_v43 }
 0x332   :  { %639 = vmatprep.subr.mxu0 %v306_v29  ;;  %672 = vmatprep.subr.mxu1 %v404_v44 }
 0x335   :  { %640 = vmatpush3.xpose.msra.mxu0 %v306_v29  ;;  %673 = vmatpush3.xpose.msra.mxu1 %v404_v44 }
 0x336   :  { %641 = vmatprep.subr.mxu0 %v305_v30  ;;  %674 = vmatprep.subr.mxu1 %v403_v45 }
 0x339   :  { %642 = vmatpush3.xpose.msra.mxu0 %v305_v30  ;;  %675 = vmatpush3.xpose.msra.mxu1 %v403_v45 }
 0x33a   :  { %643 = vmatprep.subr.mxu0 %v304_v31  ;;  %676 = vmatprep.subr.mxu1 %v402_v46 }
 0x33d   :  { %644 = vmatpush3.xpose.msra.mxu0 %v304_v31  ;;  %677 = vmatpush3.xpose.msra.mxu1 %v402_v46 }
 0x33e   :  { %645 = vmatprep.subr.mxu0 %v303_v32  ;;  %678 = vmatprep.subr.mxu1 %v401_v47 }
 0x341   :  { %646 = vmatpush3.xpose.msra.mxu0 %v303_v32  ;;  %679 = vmatpush3.xpose.msra.mxu1 %v401_v47 }
 0x342   :  { %647 = vmatprep.subr.mxu0 %v302_v33  ;;  %680 = vmatprep.subr.mxu1 %v400_v52 }
 0x345   :  { %648 = vmatpush3.xpose.msra.mxu0 %v302_v33  ;;  %681 = vmatpush3.xpose.msra.mxu1 %v400_v52 }
 0x346   :  { %682 = vmatprep.subr.mxu1 %v399_v53 }
 0x349   :  { %683 = vmatpush3.xpose.msra.mxu1 %v399_v53 }
 0x3c8   :  { %v168_v48 = vpop.f32.mrf.mxu0 }
 0x3c9   :  { %649 = vmatprep.mubr.f32.mxu0 %v168_v48  ;;  %v518_v11 = vmul.f32 %v512_v1, %v168_v48 }
 0x3ca   :  { %v611_v49 = vpop.f32.mrf.mxu0 }
 0x3cb   :  { %v520_v18 = vadd.f32 %v518_v11, %v508_v10 }
 0x3cc   :  { %v293_v50 = vpop.f32.mrf.mxu1 }
 0x3cd   :  { %650 = vmatmul.mubr.f32.vlgmr.msra.gmra.mxu0 %v293_v50  ;;  %v519_v6 = vmul.f32 %v516_v3, %v293_v50 }
 0x3ce   :  { %v616_v51 = vpop.f32.mrf.mxu1 }
 0x3cf   :  { %v521_v15 = vadd.f32 %v519_v6, %v509_v7 }
 0x48d   :  { %v651_v56 = vpop.f32.mrf.mxu0 }
 0x48e   :  { %v394_v57 = vadd.f32 %v651_v56, %v565_v55 }
 0x48f   :  { %v388_v58 = vpop.f32.mrf.mxu0 }
 0x490   :  { %v389_v59 = vadd.f32 %v565_v55, %v388_v58  ;;  %v398_v61 = vmax.f32 %v394_v57, 0.0 }
 0x492   :  { %v397_v60 = vmax.f32 %v389_v59, 0.0 }
 0x494   :  { %684 = vmatprep.mubr.f32.mxu1 %v397_v60 }
 0x495   :  { %685 = vmatmul.mubr.f32.vlgmr.msra.gmra.mxu1 %v398_v61 }
 0x555   :  { %v686_v8 = vpop.f32.mrf.mxu1 }
 0x556   :  { %v491_v12 = vadd.f32 %v686_v8, %v566_v14 }
 0x557   :  { %v485_v13 = vpop.f32.mrf.mxu1 }
 0x558   :  { %v486_v16 = vadd.f32 %v566_v14, %v485_v13  ;;  %v531_v17 = vmul.f32 %v528_v9, %v491_v12 }
 0x55a   :  { %v530_v20 = vmul.f32 %v524_v4, %v486_v16  ;;  %v533_v21 = vadd.f32 %v531_v17, %v521_v15 }
 0x55c   :  { %v535_v23 = vmul.f32 %v533_v21, %v533_v21  ;;  %v532_v24 = vadd.f32 %v530_v20, %v520_v18 }
 0x55e   :  { %538 = vadd.xlane.f32.xlu0 %v535_v23  ;;  %v534_v25 = vmul.f32 %v532_v24, %v532_v24 }
 0x560   :  { %536 = vadd.xlane.f32.xlu1 %v534_v25 }
 0x5e7   :  { %v539_v26 = vpop.xlane.xlu0 %538 }
 0x5e8   :  { %vm541_vm4 = vcmp.lt.f32.partialorder %v807_v22, %v539_v26 }
 0x5e9   :  { %v537_v27 = vpop.xlane.xlu1 %536  ;;  %v543_v29 = vsel %vm541_vm4, 1, %v740_v2 }
 0x5ea   :  { %vm540_vm3 = vcmp.lt.f32.partialorder %v801_v19, %v537_v27 }
 0x5eb   :  { %v542_v28 = vsel %vm540_vm3, 1, %v740_v2 }
 0x5ec   :  { %545 = vperm.xlu1 %700, %v542_v28  }
 0x5f0   :  { %548 = vperm.xlu1 %700, %v543_v29  }
 0x667   :  { %v546_v30 = vpop.permute.xlu1 %545 }
 0x668   :  { %vm550_vm5 = vcmp.eq.s32.totalorder %v546_v30, 1 }
 0x669   :  { %v552_v31 = vsel %vm550_vm5, %v817_v62, %v532_v24 }
 0x66a   :  { %554 = vst [vmem:[%s964_s7] sm:$0xff] %v552_v31 }
 0x66b   :  { %v549_v32 = vpop.permute.xlu1 %548 }
 0x66c   :  { %vm551_vm6 = vcmp.eq.s32.totalorder %v549_v32, 1 }
 0x66d   :  { %v553_v19 = vsel %vm551_vm6, %v823_v0, %v533_v21 }
 0x66e   :  { %555 = vst [vmem:[%s964_s7 + $0x8] sm:$0xff] %v553_v19 }
 0x66f   :  { %560 = vsyncpa [#allocation4], 1 }

</bundles_post_ra>
